<compile_context>
chip_gen: v5e
topology: v5e:2x2
jax: 0.10.0
libtpu: 0.0.40
codegen_flags: <defaults>
</compile_context>

<pallas_src>
import jax
import jax.numpy as jnp
from jax.experimental import pallas as pl
from jax.experimental.pallas import tpu as pltpu


def _normalization_kernel(x_ref, scale_ref, bias_ref, o_ref):
    # x_ref: (row_tile, H), scale_ref/bias_ref: (1, H)
    x = x_ref[...].astype(jnp.float32)
    n = x.shape[-1]

    # Issue both cross-lane reductions back-to-back (one-pass mean/var).
    s1 = jnp.sum(x, axis=-1, keepdims=True)
    s2 = jnp.sum(x * x, axis=-1, keepdims=True)

    mean = s1 * (1.0 / n)
    # Unbiased (ddof=1) variance, matching torch.std. Clamp tiny negative
    # values from cancellation in the one-pass form.
    # NOTE: n == 1 divides by zero (inf/nan), same as torch.std with ddof=1.
    var = jnp.maximum((s2 - s1 * mean) / (n - 1), 0.0)
    std = jnp.sqrt(var)

    # eps on std (not var) to match the reference; divide goes to the EUP.
    inv = pl.reciprocal(std + 1e-6, approx=True)

    scale = scale_ref[...].astype(jnp.float32)
    bias = bias_ref[...].astype(jnp.float32)
    out = (x - mean) * inv * scale + bias
    o_ref[...] = out.astype(o_ref.dtype)


def normalization(x, scale, bias, *, target_block_bytes=1 << 20):
    """x: (..., H); scale, bias: (H,). Returns same shape/dtype as x."""
    orig_shape = x.shape
    H = orig_shape[-1]
    rows = 1
    for s in orig_shape[:-1]:
        rows *= s
    x2d = x.reshape(rows, H)
    scale2d = scale.reshape(1, H)
    bias2d = bias.reshape(1, H)

    itemsize = jnp.dtype(x.dtype).itemsize
    # Sublane packing: 8 rows for 32-bit, 16 for 16-bit, 32 for 8-bit dtypes.
    pack = {1: 32, 2: 16, 4: 8}.get(itemsize, 8)

    # VMEM-sized row tile (~1 MiB of input per block), multiple of `pack`.
    row_tile = (target_block_bytes // max(H * itemsize, 1)) // pack * pack
    row_tile = max(pack, row_tile)
    # Don't overshoot the array; keep the (padded) tile a multiple of `pack`.
    rows_padded = ((rows + pack - 1) // pack) * pack
    row_tile = min(row_tile, rows_padded)

    grid = (pl.cdiv(rows, row_tile),)
    # TODO(synk): for H not a multiple of 128, stores are lane-sparse; a
    # lane-dense repack (multiple rows per vreg row) would help store-bound
    # cases but is not needed for correctness.

    out2d = pl.pallas_call(
        _normalization_kernel,
        out_shape=jax.ShapeDtypeStruct((rows, H), x.dtype),
        grid_spec=pltpu.PrefetchScalarGridSpec(
            num_scalar_prefetch=0,
            grid=grid,
            in_specs=[
                pl.BlockSpec((row_tile, H), lambda i: (i, 0)),
                pl.BlockSpec((1, H), lambda i: (0, 0)),
                pl.BlockSpec((1, H), lambda i: (0, 0)),
            ],
            out_specs=pl.BlockSpec((row_tile, H), lambda i: (i, 0)),
        ),
        compiler_params=pltpu.CompilerParams(
            dimension_semantics=("parallel",),
            vmem_limit_bytes=32 * 1024 * 1024,
        ),
    )(x2d, scale2d, bias2d)

    return out2d.reshape(orig_shape)


if __name__ == "__main__":
    key = jax.random.PRNGKey(0)
    batch, seq, hidden = 2, 8, 32

    # Deterministic parameter init matching nn.Parameter(ones/zeros(shape)).
    scale = jnp.ones((hidden,), dtype=jnp.float32)
    bias = jnp.zeros((hidden,), dtype=jnp.float32)

    x = jax.random.normal(key, (batch, seq, hidden), dtype=jnp.float32)

    out = normalization(x, scale, bias)
    out = jax.block_until_ready(out)

    # Self-check against a pure-JAX reference (unbiased std, eps on std).
    # Tolerance is loosened vs the exact-divide version because the kernel
    # uses the EUP approximate reciprocal and one-pass variance.
    mean = jnp.mean(x, axis=-1, keepdims=True)
    std = jnp.std(x, axis=-1, keepdims=True, ddof=1)
    ref = scale * (x - mean) / (std + 1e-6) + bias
    assert jnp.allclose(out, ref, atol=2e-2, rtol=2e-2), "mismatch vs reference"

    print("KERNEL_OK")
</pallas_src>

<mosaic_0001>
module attributes {stable_mosaic.version = 11 : i64} {
  func.func @_normalization_kernel(%arg0: i32, %arg1: memref<16x32xf32, #tpu.memory_space<vmem>>, %arg2: memref<1x32xf32, #tpu.memory_space<vmem>>, %arg3: memref<1x32xf32, #tpu.memory_space<vmem>>, %arg4: memref<16x32xf32, #tpu.memory_space<vmem>>) attributes {dimension_semantics = [#tpu.dimension_semantics<parallel>], iteration_bounds = array<i64: 1>, scalar_prefetch = 0 : i64, scratch_operands = 0 : i64, tpu.core_type = #tpu.core_type<tc>, window_params = [{transform_indices = @transform_0, window_bounds = array<i64: 16, 32>}, {pipeline_mode = #tpu.pipeline_mode<synchronous>, transform_indices = @transform_1, window_bounds = array<i64: 1, 32>}, {pipeline_mode = #tpu.pipeline_mode<synchronous>, transform_indices = @transform_2, window_bounds = array<i64: 1, 32>}, {transform_indices = @transform_3, window_bounds = array<i64: 16, 32>}]} {
    %c0 = arith.constant 0 : index
    %c0_0 = arith.constant 0 : index
    %0 = vector.load %arg1[%c0, %c0_0] : memref<16x32xf32, #tpu.memory_space<vmem>>, vector<16x32xf32>
    %cst = arith.constant dense<0.000000e+00> : vector<16xf32>
    %1 = vector.multi_reduction <add>, %0, %cst [1] : vector<16x32xf32> to vector<16xf32>
    %2 = vector.shape_cast %1 : vector<16xf32> to vector<16x1xf32>
    %3 = arith.mulf %0, %0 : vector<16x32xf32>
    %cst_1 = arith.constant dense<0.000000e+00> : vector<16xf32>
    %4 = vector.multi_reduction <add>, %3, %cst_1 [1] : vector<16x32xf32> to vector<16xf32>
    %5 = vector.shape_cast %4 : vector<16xf32> to vector<16x1xf32>
    %cst_2 = arith.constant 3.125000e-02 : f32
    %6 = vector.broadcast %cst_2 : f32 to vector<16x1xf32>
    %7 = arith.mulf %2, %6 : vector<16x1xf32>
    %8 = arith.mulf %2, %7 : vector<16x1xf32>
    %9 = arith.subf %5, %8 : vector<16x1xf32>
    %cst_3 = arith.constant 3.100000e+01 : f32
    %10 = vector.broadcast %cst_3 : f32 to vector<16x1xf32>
    %11 = arith.divf %9, %10 : vector<16x1xf32>
    %cst_4 = arith.constant 0.000000e+00 : f32
    %12 = vector.broadcast %cst_4 : f32 to vector<16x1xf32>
    %13 = arith.maximumf %11, %12 : vector<16x1xf32>
    %14 = math.sqrt %13 : vector<16x1xf32>
    %cst_5 = arith.constant 9.99999997E-7 : f32
    %15 = vector.broadcast %cst_5 : f32 to vector<16x1xf32>
    %16 = arith.addf %14, %15 : vector<16x1xf32>
    %17 = tpu.reciprocal %16 {approx = true} : vector<16x1xf32> -> vector<16x1xf32>
    %c0_6 = arith.constant 0 : index
    %c0_7 = arith.constant 0 : index
    %18 = vector.load %arg2[%c0_6, %c0_7] : memref<1x32xf32, #tpu.memory_space<vmem>>, vector<1x32xf32>
    %c0_8 = arith.constant 0 : index
    %c0_9 = arith.constant 0 : index
    %19 = vector.load %arg3[%c0_8, %c0_9] : memref<1x32xf32, #tpu.memory_space<vmem>>, vector<1x32xf32>
    %20 = vector.broadcast %7 : vector<16x1xf32> to vector<16x32xf32>
    %21 = arith.subf %0, %20 : vector<16x32xf32>
    %22 = vector.broadcast %17 : vector<16x1xf32> to vector<16x32xf32>
    %23 = arith.mulf %21, %22 : vector<16x32xf32>
    %24 = vector.broadcast %18 : vector<1x32xf32> to vector<16x32xf32>
    %25 = arith.mulf %23, %24 : vector<16x32xf32>
    %26 = vector.broadcast %19 : vector<1x32xf32> to vector<16x32xf32>
    %27 = arith.addf %25, %26 : vector<16x32xf32>
    %c0_10 = arith.constant 0 : index
    %c0_11 = arith.constant 0 : index
    %28 = vector.load %arg4[%c0_10, %c0_11] : memref<16x32xf32, #tpu.memory_space<vmem>>, vector<16x32xf32>
    tpu.vector_store %arg4[%c0_10, %c0_11], %27 {strides = array<i32>} : memref<16x32xf32, #tpu.memory_space<vmem>>, vector<16x32xf32>,
    return
  }
  func.func @transform_0(%arg0: i32) -> (i32, i32) {
    %c0_i32 = arith.constant 0 : i32
    %c0_i32_0 = arith.constant 0 : i32
    return %arg0, %c0_i32 : i32, i32
  }
  func.func @transform_1(%arg0: i32) -> (i32, i32) {
    %c0_i32 = arith.constant 0 : i32
    %c0_i32_0 = arith.constant 0 : i32
    %c0_i32_1 = arith.constant 0 : i32
    return %c0_i32, %c0_i32_0 : i32, i32
  }
  func.func @transform_2(%arg0: i32) -> (i32, i32) {
    %c0_i32 = arith.constant 0 : i32
    %c0_i32_0 = arith.constant 0 : i32
    %c0_i32_1 = arith.constant 0 : i32
    return %c0_i32, %c0_i32_0 : i32, i32
  }
  func.func @transform_3(%arg0: i32) -> (i32, i32) {
    %c0_i32 = arith.constant 0 : i32
    %c0_i32_0 = arith.constant 0 : i32
    return %arg0, %c0_i32 : i32, i32
  }
}

</mosaic_0001>

<bundles_post_ra>
// kernel: tpu_custom_call.1
= control target key start
LH: loop header
LB: loop body
LE: loop exit
PB: predicated region body
PF: predicated region fallthrough
CT: control target
= control target key end

     0   :  { %8 = vsyncpa [#allocation3], 0  ;;  %s303_s0 = inlined_call_operand.hbm [shape: f32[16,32], index: 0, kind: input, shape index: {}]   ;;  %s304_s1 = inlined_call_operand.hbm [shape: f32[1,32], index: 1, kind: input, shape index: {}]   ;;  %s305_s2 = inlined_call_operand.vmem [shape: f32[1,32], index: 2, kind: input, shape index: {}]   ;;  %s306_s3 = inlined_call_operand.hbm [shape: f32[16,32], index: 3, kind: output, shape index: {}]  }
   0x1   :  { %9 = vsyncpa [#allocation6], 0 }
   0x2   :  { %10 = vsyncpa [#allocation4], 0  ;;  %s15_s14 = sshll.u32 %s303_s0, 4  ;;  %s241_s15 = smov [#allocation2]   ;;  %s16_s14 = int_to_ptr.hbm [resolvable:$true] %s15_s14 }
   0x3   :  { %s17_s16 = sshll.u32 %s241_s15, 4  ;;  %s29_s19 = sshll.u32 %s304_s1, 4  ;;  %s18_s16 = int_to_ptr.vmem [resolvable:$true] %s17_s16  ;;  %s30_s19 = int_to_ptr.hbm [resolvable:$true] %s29_s19 }
   0x4   :  { %s242_s20 = smov 128   ;;  %s243_s21 = smov 8  }
   0x5   :  { %23 = dma.hbm_to_vmem [thread:$0]  %s16_s14, 256, %s18_s16, [#allocation3], %s242_s20, %s242_s20, %s243_s21  }
   0x6   :  { %s244_s22 = smov [#allocation5]  }
   0x7   :  { %s31_s23 = sshll.u32 %s244_s22, 4  ;;  %s32_s23 = int_to_ptr.vmem [resolvable:$true] %s31_s23 }
   0x8   :  { %34 = dma.hbm_to_vmem [thread:$0]  %s30_s19, 16, %s32_s23, [#allocation6]  }
   0x9   :  { %235 = dma.done.wait [#allocation3], 256  }
   0xa   :  { %236 = vsyncadd [#allocation3], 4294967040 }
   0xb   :  { %237 = dma.done.wait [#allocation6], 16  }
   0xc   :  { %238 = vsyncadd [#allocation6], 4294967280  ;;  %vm47_vm0 = vcmask 261120   ;;  %v276_v0 = vld [vmem:[#allocation2] sm:$0xff]  ;;  %v283_v4 = vld [vmem:[#allocation2 + $0x8] sm:$0xff]  ;;  %v245_v8 = vmov 31.0  }
   0xd   :  { %v48_v1 = vsel %vm47_vm0, %v276_v0, 0.0  ;;  %v54_v2 = vmul.f32 %v276_v0, %v276_v0  ;;  %v55_v5 = vmul.f32 %v283_v4, %v283_v4  ;;  %v51_v6 = vsel %vm47_vm0, %v283_v4, 0.0  ;;  %v151_v51 = vld [vmem:[#allocation5] ss:$0 sm:$0xff]  ;;  %v152_v55 = vld [vmem:[%s305_s2] ss:$0 sm:$0xff] }
   0xe   :  { %49 = vadd.xlane.f32.xlu0 %v48_v1  ;;  %153 = vrcp.f32 %v245_v8  ;;  %s246_s24 = smov [#allocation7]   ;;  %s131_s28 = sshll.u32 %s306_s3, 4  ;;  %s132_s28 = int_to_ptr.hbm [resolvable:$true] %s131_s28 }
   0xf   :  { %v56_v3 = vsel %vm47_vm0, %v54_v2, 0.0  ;;  %v59_v7 = vsel %vm47_vm0, %v55_v5, 0.0  ;;  %s129_s25 = sshll.u32 %s246_s24, 4  ;;  %s130_s25 = int_to_ptr.vmem [resolvable:$true] %s129_s25 }
  0x10   :  { %57 = vadd.xlane.f32.xlu1 %v56_v3 }
  0x14   :  { %v154_v9 = vpop.eup %153 }
  0x15   :  { %v69_v10 = vmul.f32 31.0, %v154_v9  ;;  %vm73_vm1 = vweird.f32 %v154_v9 }
  0x16   :  { %52 = vadd.xlane.f32.xlu0 %v51_v6 }
  0x17   :  { %v70_v11 = vsub.f32 1.0, %v69_v10 }
  0x18   :  { %60 = vadd.xlane.f32.xlu1 %v59_v7 }
  0x19   :  { %v71_v12 = vmul.f32 %v154_v9, %v70_v11 }
  0x1b   :  { %v72_v14 = vadd.f32 %v154_v9, %v71_v12 }
  0x1d   :  { %v74_v18 = vsel %vm73_vm1, %v154_v9, %v72_v14 }
  0x81   :  { %v50_v13 = vpop.xlane.xlu0 %49 }
  0x82   :  { %v62_v15 = vmul.f32 0.03125, %v50_v13 }
  0x83   :  { %v58_v16 = vpop.xlane.xlu1 %57 }
  0x84   :  { %v64_v17 = vmul.f32 %v62_v15, %v50_v13  ;;  %v109_v49 = vsub.f32 %v276_v0, %v62_v15 }
  0x86   :  { %v66_v19 = vsub.f32 %v58_v16, %v64_v17 }
  0x88   :  { %v75_v20 = vmul.f32 %v74_v18, %v66_v19 }
  0x89   :  { %v53_v21 = vpop.xlane.xlu0 %52 }
  0x8a   :  { %v77_v22 = vmax.f32 %v75_v20, 0.0  ;;  %v63_v23 = vmul.f32 0.03125, %v53_v21 }
  0x8b   :  { %v61_v24 = vpop.xlane.xlu1 %60 }
  0x8c   :  { %155 = vrsqrt.f32 %v77_v22  ;;  %v65_v25 = vmul.f32 %v63_v23, %v53_v21  ;;  %vm86_vm2 = vcmp.eq.f32.partialorder %v77_v22, inf  ;;  %v89_v39 = vand.u32 2147483648, %v77_v22 }
  0x8d   :  { %vm88_vm3 = vcmp.eq.f32.partialorder %v77_v22, 0.0  ;;  %v110_v58 = vsub.f32 %v283_v4, %v63_v23 }
  0x8e   :  { %v67_v26 = vsub.f32 %v61_v24, %v65_v25 }
  0x90   :  { %v76_v27 = vmul.f32 %v74_v18, %v67_v26 }
  0x92   :  { %v156_v28 = vpop.eup %155  ;;  %v78_v29 = vmax.f32 %v76_v27, 0.0 }
  0x93   :  { %v80_v30 = vmul.f32 %v156_v28, %v77_v22 }
  0x94   :  { %157 = vrsqrt.f32 %v78_v29  ;;  %vm98_vm4 = vcmp.eq.f32.partialorder %v78_v29, inf  ;;  %v101_v47 = vand.u32 2147483648, %v78_v29  ;;  %vm100_vm5 = vcmp.eq.f32.partialorder %v78_v29, 0.0 }
  0x95   :  { %v81_v31 = vmul.f32 %v156_v28, %v80_v30 }
  0x97   :  { %v82_v32 = vmul.f32 0.5, %v81_v31 }
  0x99   :  { %v83_v33 = vsub.f32 1.5, %v82_v32 }
  0x9a   :  { %v158_v34 = vpop.eup %157 }
  0x9b   :  { %v84_v35 = vmul.f32 %v156_v28, %v83_v33  ;;  %v92_v36 = vmul.f32 %v158_v34, %v78_v29 }
  0x9d   :  { %v85_v37 = vmul.f32 %v84_v35, %v77_v22  ;;  %v93_v38 = vmul.f32 %v158_v34, %v92_v36 }
  0x9f   :  { %v94_v40 = vmul.f32 0.5, %v93_v38  ;;  %v87_v41 = vsel %vm86_vm2, %v77_v22, %v85_v37 }
  0xa0   :  { %v90_v42 = vsel %vm88_vm3, %v89_v39, %v87_v41 }
  0xa1   :  { %v95_v43 = vsub.f32 1.5, %v94_v40  ;;  %v103_v44 = vadd.f32 1e-06, %v90_v42 }
  0xa3   :  { %v96_v45 = vmul.f32 %v158_v34, %v95_v43  ;;  %159 = vrcp.f32 %v103_v44 }
  0xa5   :  { %v97_v46 = vmul.f32 %v96_v45, %v78_v29 }
  0xa7   :  { %v99_v48 = vsel %vm98_vm4, %v78_v29, %v97_v46 }
  0xa8   :  { %v102_v50 = vsel %vm100_vm5, %v101_v47, %v99_v48 }
  0xa9   :  { %v160_v52 = vpop.eup %159  ;;  %v104_v53 = vadd.f32 1e-06, %v102_v50 }
  0xaa   :  { %v111_v54 = vmul.f32 %v160_v52, %v109_v49 }
  0xab   :  { %161 = vrcp.f32 %v104_v53 }
  0xac   :  { %v116_v56 = vmul.f32 %v151_v51, %v111_v54 }
  0xae   :  { %v121_v57 = vadd.f32 %v152_v55, %v116_v56 }
  0xb0   :  { %123 = vst.msk [vmem:[#allocation7] sm:$0xff] %vm47_vm0, %v121_v57 }
  0xb1   :  { %v162_v59 = vpop.eup %161 }
  0xb2   :  { %v112_v60 = vmul.f32 %v162_v59, %v110_v58 }
  0xb4   :  { %v117_v61 = vmul.f32 %v151_v51, %v112_v60 }
  0xb6   :  { %v122_v62 = vadd.f32 %v152_v55, %v117_v61 }
  0xb8   :  { %124 = vst.msk [vmem:[#allocation7 + $0x8] sm:$0xff] %vm47_vm0, %v122_v62 }
  0xb9   :  { %137 = dma.vmem_to_hbm [thread:$0]  %s130_s25, 256, %s132_s28, [#allocation4], %s242_s20, %s242_s20, %s243_s21  }
  0xba   :  { %239 = dma.done.wait [#allocation4], 256  }
  0xbb   :  { %240 = vsyncadd [#allocation4], 4294967040 }
  0xbc   :  { %142 = vsyncpa [#allocation3], 1 }
  0xbd   :  { %143 = vsyncpa [#allocation6], 1 }
  0xbe   :  { %144 = vsyncpa [#allocation4], 1 }

</bundles_post_ra>
